<compile_context>
chip_gen: v6e
topology: v6e:2x2x1
jax: 0.10.0
libtpu: 0.0.40
codegen_flags: <defaults>
</compile_context>

<pallas_src>
import jax
import jax.numpy as jnp
from jax.experimental import pallas as pl
from jax.experimental.pallas import tpu as pltpu


def _latent_lpips_kernel(zi_ref, zp_ref, w1_ref, b1_ref, w2_ref, b2_ref,
                         wf_ref, bf_ref, wlin_ref,
                         l2_out_ref, perc_out_ref,
                         acc_l2_ref, acc_d_ref):
    t = pl.program_id(1)

    @pl.when(t == 0)
    def _():
        acc_l2_ref[...] = jnp.zeros_like(acc_l2_ref)
        acc_d_ref[...] = jnp.zeros_like(acc_d_ref)

    zi = zi_ref[...].astype(jnp.float32)   # (Cz, TS): channels on sublanes,
    zp = zp_ref[...].astype(jnp.float32)   # pixels on lanes (lane-dense)

    # ---- latent L2: vector accumulator, no per-step reduction --------------
    dz = zi - zp
    acc_l2_ref[...] += dz * dz

    # ---- shared-weight per-pixel MLP; no concat copies, channel axis = K ---
    w1 = w1_ref[...]
    b1 = b1_ref[...]
    w2 = w2_ref[...]
    b2 = b2_ref[...]
    wf = wf_ref[...]
    bf = bf_ref[...]

    def lpips_feats(z):
        # synthetic decoder.decode: per-pixel MLP (stack of 1x1 convs)
        h = jnp.dot(w1, z, preferred_element_type=jnp.float32)
        h = jnp.maximum(h + b1, 0.0)                        # (Ch, TS)
        img = jnp.dot(w2, h, preferred_element_type=jnp.float32) + b2  # (3, TS)
        # LPIPS-style features: 1x1 conv + ReLU + unit channel normalization
        f = jnp.dot(wf, img, preferred_element_type=jnp.float32)
        f = jnp.maximum(f + bf, 0.0)                        # (Cf, TS)
        ssq = jnp.sum(f * f, axis=0, keepdims=True)         # XLU sublane reduce
        return f / (jnp.sqrt(ssq) + 1e-10)

    d = lpips_feats(zi) - lpips_feats(zp)                   # (Cf, TS)
    # wlin projection hoisted out of the loop; accumulate raw squared diffs.
    acc_d_ref[...] += d * d

    @pl.when(t == pl.num_programs(1) - 1)
    def _():
        l2_partial = jnp.sum(acc_l2_ref[...])
        perc_partial = jnp.sum(acc_d_ref[...] * wlin_ref[...])
        l2_out_ref[...] = jnp.broadcast_to(l2_partial, l2_out_ref.shape)
        perc_out_ref[...] = jnp.broadcast_to(perc_partial, perc_out_ref.shape)


def make_params(cz=4, ch=32, cf=16, seed=0):
    """Deterministic synthetic decoder + perceptual weights."""
    keys = jax.random.split(jax.random.PRNGKey(seed), 6)
    w1 = jax.random.normal(keys[1], (cz, ch), jnp.float32) * 0.2
    b1 = jnp.zeros((1, ch), jnp.float32)
    w2 = jax.random.normal(keys[2], (ch, 3), jnp.float32) * 0.2
    b2 = jnp.zeros((1, 3), jnp.float32)
    wf = jax.random.normal(keys[3], (3, cf), jnp.float32) * 0.5
    bf = jax.random.normal(keys[4], (1, cf), jnp.float32) * 0.05
    wlin = jnp.abs(jax.random.normal(keys[5], (cf, 1), jnp.float32)) * 0.1
    return dict(w1=w1, b1=b1, w2=w2, b2=b2, wf=wf, bf=bf, wlin=wlin)


def _pick_tile_s(s, cap=4096):
    """Largest lane-aligned (multiple of 128) divisor of s up to cap, else s."""
    if s <= cap:
        return s
    t = cap - (cap % 128)
    while t >= 128:
        if s % t == 0:
            return t
        t -= 128
    return s  # not 128-divisible: fall back to one full-spatial block


def latent_lpips_forward(latent_inputs, latent_predictions, image_inputs, params,
                         latent_weight=1.0, perceptual_weight=1.0,
                         split="train", tile_s=None):
    """Mirrors LatentLPIPS.forward with perceptual_weight_on_inputs == 0.0.

    latent_inputs / latent_predictions: NCHW (B, Cz, H, W) like PyTorch.
    image_inputs: unused here (perceptual_weight_on_inputs == 0.0).
    Returns (loss, log_dict).
    """
    # TODO(synk): perceptual_weight_on_inputs > 0 branch (bicubic antialiased
    # interpolate + LPIPS on raw image_inputs) is not implemented.
    del image_inputs

    B, Cz, H, W = latent_inputs.shape
    S = H * W
    # Native NCHW layout kept: (B, Cz, H, W) -> (B, Cz, S) is a free reshape.
    zi = latent_inputs.reshape(B, Cz, S)
    zp = latent_predictions.reshape(B, Cz, S)

    if tile_s is None:
        tile_s = _pick_tile_s(S)
    tile_s = min(tile_s, S)
    assert S % tile_s == 0, "H*W must be divisible by tile_s"
    assert tile_s % 128 == 0 or tile_s == S, "tile_s must be lane aligned"
    n_tiles = S // tile_s

    # Transpose the tiny weights once on the host so every layer contracts the
    # channel axis while pixels stay on the lane axis.
    w1t = params["w1"].T                      # (Ch, Cz)
    b1 = params["b1"].reshape(-1, 1)          # (Ch, 1)
    w2t = params["w2"].T                      # (3, Ch)
    b2 = params["b2"].reshape(-1, 1)          # (3, 1)
    wft = params["wf"].T                      # (Cf, 3)
    bf = params["bf"].reshape(-1, 1)          # (Cf, 1)
    wlin = params["wlin"]                     # (Cf, 1)
    ch = w1t.shape[0]
    cf = wft.shape[0]

    def weight_spec(shape):
        return pl.BlockSpec(shape, lambda b, t: (0, 0))

    stream_spec = pl.BlockSpec((None, Cz, tile_s), lambda b, t: (b, 0, t))
    partial_spec = pl.BlockSpec((None, 8, 128), lambda b, t: (b, 0, 0))

    partial_l2, partial_perc = pl.pallas_call(
        _latent_lpips_kernel,
        out_shape=(
            jax.ShapeDtypeStruct((B, 8, 128), jnp.float32),  # per-b L2 sums
            jax.ShapeDtypeStruct((B, 8, 128), jnp.float32),  # per-b perc sums
        ),
        grid_spec=pltpu.PrefetchScalarGridSpec(
            num_scalar_prefetch=0,
            grid=(B, n_tiles),
            in_specs=[
                stream_spec,                  # zi  (B, Cz, S)
                stream_spec,                  # zp  (B, Cz, S)
                weight_spec((ch, Cz)),        # w1^T
                weight_spec((ch, 1)),         # b1
                weight_spec((3, ch)),         # w2^T
                weight_spec((3, 1)),          # b2
                weight_spec((cf, 3)),         # wf^T
                weight_spec((cf, 1)),         # bf
                weight_spec((cf, 1)),         # wlin
            ],
            out_specs=(partial_spec, partial_spec),
            scratch_shapes=[
                pltpu.VMEM((Cz, tile_s), jnp.float32),   # latent-L2 accumulator
                pltpu.VMEM((cf, tile_s), jnp.float32),   # feature-diff accumulator
            ],
        ),
        compiler_params=pltpu.CompilerParams(
            dimension_semantics=("parallel", "arbitrary")),
    )(zi, zp, w1t, b1, w2t, b2, wft, bf, wlin)

    n_pix = B * S
    latent_l2 = jnp.sum(partial_l2[:, 0, 0]) / jnp.float32(n_pix * Cz)
    perc = jnp.sum(partial_perc[:, 0, 0]) / jnp.float32(n_pix)
    loss = latent_weight * latent_l2 + perceptual_weight * perc
    log = {
        f"{split}/latent_l2_loss": latent_l2,
        f"{split}/perceptual_loss": perc,
    }
    return loss, log


def _reference(latent_inputs, latent_predictions, params,
               latent_weight=1.0, perceptual_weight=1.0):
    """Pure-JAX reference for a sanity check (PyTorch-style NHWC math)."""
    B, Cz, H, W = latent_inputs.shape
    zi = jnp.transpose(latent_inputs, (0, 2, 3, 1)).reshape(-1, Cz)
    zp = jnp.transpose(latent_predictions, (0, 2, 3, 1)).reshape(-1, Cz)
    l2 = jnp.mean((zi - zp) ** 2)

    def decode(z):
        h = jnp.maximum(z @ params["w1"] + params["b1"], 0.0)
        return h @ params["w2"] + params["b2"]

    def feats(img):
        f = jnp.maximum(img @ params["wf"] + params["bf"], 0.0)
        n = jnp.sqrt(jnp.sum(f * f, axis=-1, keepdims=True))
        return f / (n + 1e-10)

    ft, fr = feats(decode(zi)), feats(decode(zp))
    perc = jnp.mean(((ft - fr) ** 2) @ params["wlin"])
    return latent_weight * l2 + perceptual_weight * perc, l2, perc


if __name__ == "__main__":
    B, Cz, H, W = 2, 4, 16, 16
    key = jax.random.PRNGKey(0)
    k1, k2, k3 = jax.random.split(key, 3)
    latent_inputs = jax.random.normal(k1, (B, Cz, H, W), jnp.float32)
    latent_predictions = latent_inputs + 0.1 * jax.random.normal(
        k2, (B, Cz, H, W), jnp.float32)
    image_inputs = jax.random.normal(k3, (B, 3, H, W), jnp.float32)  # unused

    params = make_params(cz=Cz, ch=32, cf=16, seed=0)

    loss, log = latent_lpips_forward(
        latent_inputs, latent_predictions, image_inputs, params,
        latent_weight=1.0, perceptual_weight=1.0, split="train")
    loss = jax.block_until_ready(loss)

    ref_loss, ref_l2, ref_perc = _reference(latent_inputs, latent_predictions, params)
    assert jnp.allclose(loss, ref_loss, rtol=1e-3, atol=1e-5)
    assert jnp.allclose(log["train/latent_l2_loss"], ref_l2, rtol=1e-3, atol=1e-5)
    assert jnp.allclose(log["train/perceptual_loss"], ref_perc, rtol=1e-3, atol=1e-5)

    print("KERNEL_OK")
</pallas_src>

<mosaic_0001>
module attributes {stable_mosaic.version = 11 : i64} {
  func.func @_latent_lpips_kernel(%arg0: i32, %arg1: i32, %arg2: memref<1x4x256xf32, #tpu.memory_space<vmem>>, %arg3: memref<1x4x256xf32, #tpu.memory_space<vmem>>, %arg4: memref<32x4xf32, #tpu.memory_space<vmem>>, %arg5: memref<32x1xf32, #tpu.memory_space<vmem>>, %arg6: memref<3x32xf32, #tpu.memory_space<vmem>>, %arg7: memref<3x1xf32, #tpu.memory_space<vmem>>, %arg8: memref<16x3xf32, #tpu.memory_space<vmem>>, %arg9: memref<16x1xf32, #tpu.memory_space<vmem>>, %arg10: memref<16x1xf32, #tpu.memory_space<vmem>>, %arg11: memref<1x8x128xf32, #tpu.memory_space<vmem>>, %arg12: memref<1x8x128xf32, #tpu.memory_space<vmem>>, %arg13: memref<4x256xf32, #tpu.memory_space<vmem>>, %arg14: memref<16x256xf32, #tpu.memory_space<vmem>>) attributes {dimension_semantics = [#tpu.dimension_semantics<parallel>, #tpu.dimension_semantics<arbitrary>], iteration_bounds = array<i64: 2, 1>, scalar_prefetch = 0 : i64, scratch_operands = 2 : i64, tpu.core_type = #tpu.core_type<tc>, window_params = [{transform_indices = @transform_0, window_bounds = array<i64: 1, 4, 256>}, {transform_indices = @transform_1, window_bounds = array<i64: 1, 4, 256>}, {pipeline_mode = #tpu.pipeline_mode<synchronous>, transform_indices = @transform_2, window_bounds = array<i64: 32, 4>}, {pipeline_mode = #tpu.pipeline_mode<synchronous>, transform_indices = @transform_3, window_bounds = array<i64: 32, 1>}, {pipeline_mode = #tpu.pipeline_mode<synchronous>, transform_indices = @transform_4, window_bounds = array<i64: 3, 32>}, {pipeline_mode = #tpu.pipeline_mode<synchronous>, transform_indices = @transform_5, window_bounds = array<i64: 3, 1>}, {pipeline_mode = #tpu.pipeline_mode<synchronous>, transform_indices = @transform_6, window_bounds = array<i64: 16, 3>}, {pipeline_mode = #tpu.pipeline_mode<synchronous>, transform_indices = @transform_7, window_bounds = array<i64: 16, 1>}, {pipeline_mode = #tpu.pipeline_mode<synchronous>, transform_indices = @transform_8, window_bounds = array<i64: 16, 1>}, {transform_indices = @transform_9, window_bounds = array<i64: 1, 8, 128>}, {transform_indices = @transform_10, window_bounds = array<i64: 1, 8, 128>}]} {
    %c0_i32 = arith.constant 0 : i32
    %0 = arith.cmpi eq, %arg1, %c0_i32 : i32
    %1 = arith.extui %0 : i1 to i32
    %c0_i32_0 = arith.constant 0 : i32
    %2 = arith.cmpi ne, %1, %c0_i32_0 : i32
    scf.if %2 {
      %cst_41 = arith.constant 0.000000e+00 : f32
      %68 = vector.broadcast %cst_41 : f32 to vector<4x256xf32>
      %c0_42 = arith.constant 0 : index
      %c0_43 = arith.constant 0 : index
      %69 = vector.load %arg13[%c0_42, %c0_43] : memref<4x256xf32, #tpu.memory_space<vmem>>, vector<4x256xf32>
      tpu.vector_store %arg13[%c0_42, %c0_43], %68 {strides = array<i32>} : memref<4x256xf32, #tpu.memory_space<vmem>>, vector<4x256xf32>,
      %cst_44 = arith.constant 0.000000e+00 : f32
      %70 = vector.broadcast %cst_44 : f32 to vector<16x256xf32>
      %c0_45 = arith.constant 0 : index
      %c0_46 = arith.constant 0 : index
      %71 = vector.load %arg14[%c0_45, %c0_46] : memref<16x256xf32, #tpu.memory_space<vmem>>, vector<16x256xf32>
      tpu.vector_store %arg14[%c0_45, %c0_46], %70 {strides = array<i32>} : memref<16x256xf32, #tpu.memory_space<vmem>>, vector<16x256xf32>,
    } else {
    }
    %c0 = arith.constant 0 : index
    %c0_1 = arith.constant 0 : index
    %c0_2 = arith.constant 0 : index
    %3 = vector.load %arg2[%c0, %c0_1, %c0_2] : memref<1x4x256xf32, #tpu.memory_space<vmem>>, vector<1x4x256xf32>
    %4 = vector.shape_cast %3 : vector<1x4x256xf32> to vector<4x256xf32>
    %c0_3 = arith.constant 0 : index
    %c0_4 = arith.constant 0 : index
    %c0_5 = arith.constant 0 : index
    %5 = vector.load %arg3[%c0_3, %c0_4, %c0_5] : memref<1x4x256xf32, #tpu.memory_space<vmem>>, vector<1x4x256xf32>
    %6 = vector.shape_cast %5 : vector<1x4x256xf32> to vector<4x256xf32>
    %7 = arith.subf %4, %6 : vector<4x256xf32>
    %c0_6 = arith.constant 0 : index
    %c0_7 = arith.constant 0 : index
    %8 = vector.load %arg13[%c0_6, %c0_7] : memref<4x256xf32, #tpu.memory_space<vmem>>, vector<4x256xf32>
    %9 = arith.mulf %7, %7 : vector<4x256xf32>
    %10 = arith.addf %8, %9 : vector<4x256xf32>
    %c0_8 = arith.constant 0 : index
    %c0_9 = arith.constant 0 : index
    %11 = vector.load %arg13[%c0_8, %c0_9] : memref<4x256xf32, #tpu.memory_space<vmem>>, vector<4x256xf32>
    tpu.vector_store %arg13[%c0_8, %c0_9], %10 {strides = array<i32>} : memref<4x256xf32, #tpu.memory_space<vmem>>, vector<4x256xf32>,
    %c0_10 = arith.constant 0 : index
    %c0_11 = arith.constant 0 : index
    %12 = vector.load %arg4[%c0_10, %c0_11] : memref<32x4xf32, #tpu.memory_space<vmem>>, vector<32x4xf32>
    %c0_12 = arith.constant 0 : index
    %c0_13 = arith.constant 0 : index
    %13 = vector.load %arg5[%c0_12, %c0_13] : memref<32x1xf32, #tpu.memory_space<vmem>>, vector<32x1xf32>
    %c0_14 = arith.constant 0 : index
    %c0_15 = arith.constant 0 : index
    %14 = vector.load %arg6[%c0_14, %c0_15] : memref<3x32xf32, #tpu.memory_space<vmem>>, vector<3x32xf32>
    %c0_16 = arith.constant 0 : index
    %c0_17 = arith.constant 0 : index
    %15 = vector.load %arg7[%c0_16, %c0_17] : memref<3x1xf32, #tpu.memory_space<vmem>>, vector<3x1xf32>
    %c0_18 = arith.constant 0 : index
    %c0_19 = arith.constant 0 : index
    %16 = vector.load %arg8[%c0_18, %c0_19] : memref<16x3xf32, #tpu.memory_space<vmem>>, vector<16x3xf32>
    %c0_20 = arith.constant 0 : index
    %c0_21 = arith.constant 0 : index
    %17 = vector.load %arg9[%c0_20, %c0_21] : memref<16x1xf32, #tpu.memory_space<vmem>>, vector<16x1xf32>
    %cst = arith.constant dense<0.000000e+00> : vector<32x256xf32>
    %18 = tpu.matmul %12, %4, %cst {dimension_numbers = #tpu.dot_dimension_numbers<[1], [0], [0], [1], [0, 0, 1, 1], [], []>} : vector<32x4xf32>, vector<4x256xf32>, vector<32x256xf32> -> vector<32x256xf32>
    %19 = vector.broadcast %13 : vector<32x1xf32> to vector<32x256xf32>
    %20 = arith.addf %18, %19 : vector<32x256xf32>
    %cst_22 = arith.constant 0.000000e+00 : f32
    %21 = vector.broadcast %cst_22 : f32 to vector<32x256xf32>
    %22 = arith.maximumf %20, %21 : vector<32x256xf32>
    %cst_23 = arith.constant dense<0.000000e+00> : vector<3x256xf32>
    %23 = tpu.matmul %14, %22, %cst_23 {dimension_numbers = #tpu.dot_dimension_numbers<[1], [0], [0], [1], [0, 0, 1, 1], [], []>} : vector<3x32xf32>, vector<32x256xf32>, vector<3x256xf32> -> vector<3x256xf32>
    %24 = vector.broadcast %15 : vector<3x1xf32> to vector<3x256xf32>
    %25 = arith.addf %23, %24 : vector<3x256xf32>
    %cst_24 = arith.constant dense<0.000000e+00> : vector<16x256xf32>
    %26 = tpu.matmul %16, %25, %cst_24 {dimension_numbers = #tpu.dot_dimension_numbers<[1], [0], [0], [1], [0, 0, 1, 1], [], []>} : vector<16x3xf32>, vector<3x256xf32>, vector<16x256xf32> -> vector<16x256xf32>
    %27 = vector.broadcast %17 : vector<16x1xf32> to vector<16x256xf32>
    %28 = arith.addf %26, %27 : vector<16x256xf32>
    %cst_25 = arith.constant 0.000000e+00 : f32
    %29 = vector.broadcast %cst_25 : f32 to vector<16x256xf32>
    %30 = arith.maximumf %28, %29 : vector<16x256xf32>
    %31 = arith.mulf %30, %30 : vector<16x256xf32>
    %cst_26 = arith.constant dense<0.000000e+00> : vector<256xf32>
    %32 = vector.multi_reduction <add>, %31, %cst_26 [0] : vector<16x256xf32> to vector<256xf32>
    %33 = vector.shape_cast %32 : vector<256xf32> to vector<1x256xf32>
    %34 = math.sqrt %33 : vector<1x256xf32>
    %cst_27 = arith.constant 1.000000e-10 : f32
    %35 = vector.broadcast %cst_27 : f32 to vector<1x256xf32>
    %36 = arith.addf %34, %35 : vector<1x256xf32>
    %37 = vector.broadcast %36 : vector<1x256xf32> to vector<16x256xf32>
    %38 = arith.divf %30, %37 : vector<16x256xf32>
    %cst_28 = arith.constant dense<0.000000e+00> : vector<32x256xf32>
    %39 = tpu.matmul %12, %6, %cst_28 {dimension_numbers = #tpu.dot_dimension_numbers<[1], [0], [0], [1], [0, 0, 1, 1], [], []>} : vector<32x4xf32>, vector<4x256xf32>, vector<32x256xf32> -> vector<32x256xf32>
    %40 = vector.broadcast %13 : vector<32x1xf32> to vector<32x256xf32>
    %41 = arith.addf %39, %40 : vector<32x256xf32>
    %cst_29 = arith.constant 0.000000e+00 : f32
    %42 = vector.broadcast %cst_29 : f32 to vector<32x256xf32>
    %43 = arith.maximumf %41, %42 : vector<32x256xf32>
    %cst_30 = arith.constant dense<0.000000e+00> : vector<3x256xf32>
    %44 = tpu.matmul %14, %43, %cst_30 {dimension_numbers = #tpu.dot_dimension_numbers<[1], [0], [0], [1], [0, 0, 1, 1], [], []>} : vector<3x32xf32>, vector<32x256xf32>, vector<3x256xf32> -> vector<3x256xf32>
    %45 = vector.broadcast %15 : vector<3x1xf32> to vector<3x256xf32>
    %46 = arith.addf %44, %45 : vector<3x256xf32>
    %cst_31 = arith.constant dense<0.000000e+00> : vector<16x256xf32>
    %47 = tpu.matmul %16, %46, %cst_31 {dimension_numbers = #tpu.dot_dimension_numbers<[1], [0], [0], [1], [0, 0, 1, 1], [], []>} : vector<16x3xf32>, vector<3x256xf32>, vector<16x256xf32> -> vector<16x256xf32>
    %48 = vector.broadcast %17 : vector<16x1xf32> to vector<16x256xf32>
    %49 = arith.addf %47, %48 : vector<16x256xf32>
    %cst_32 = arith.constant 0.000000e+00 : f32
    %50 = vector.broadcast %cst_32 : f32 to vector<16x256xf32>
    %51 = arith.maximumf %49, %50 : vector<16x256xf32>
    %52 = arith.mulf %51, %51 : vector<16x256xf32>
    %cst_33 = arith.constant dense<0.000000e+00> : vector<256xf32>
    %53 = vector.multi_reduction <add>, %52, %cst_33 [0] : vector<16x256xf32> to vector<256xf32>
    %54 = vector.shape_cast %53 : vector<256xf32> to vector<1x256xf32>
    %55 = math.sqrt %54 : vector<1x256xf32>
    %cst_34 = arith.constant 1.000000e-10 : f32
    %56 = vector.broadcast %cst_34 : f32 to vector<1x256xf32>
    %57 = arith.addf %55, %56 : vector<1x256xf32>
    %58 = vector.broadcast %57 : vector<1x256xf32> to vector<16x256xf32>
    %59 = arith.divf %51, %58 : vector<16x256xf32>
    %60 = arith.subf %38, %59 : vector<16x256xf32>
    %c0_35 = arith.constant 0 : index
    %c0_36 = arith.constant 0 : index
    %61 = vector.load %arg14[%c0_35, %c0_36] : memref<16x256xf32, #tpu.memory_space<vmem>>, vector<16x256xf32>
    %62 = arith.mulf %60, %60 : vector<16x256xf32>
    %63 = arith.addf %61, %62 : vector<16x256xf32>
    %c0_37 = arith.constant 0 : index
    %c0_38 = arith.constant 0 : index
    %64 = vector.load %arg14[%c0_37, %c0_38] : memref<16x256xf32, #tpu.memory_space<vmem>>, vector<16x256xf32>
    tpu.vector_store %arg14[%c0_37, %c0_38], %63 {strides = array<i32>} : memref<16x256xf32, #tpu.memory_space<vmem>>, vector<16x256xf32>,
    %c0_i32_39 = arith.constant 0 : i32
    %65 = arith.cmpi eq, %arg1, %c0_i32_39 : i32
    %66 = arith.extui %65 : i1 to i32
    %c0_i32_40 = arith.constant 0 : i32
    %67 = arith.cmpi ne, %66, %c0_i32_40 : i32
    scf.if %67 {
      %c0_41 = arith.constant 0 : index
      %c0_42 = arith.constant 0 : index
      %68 = vector.load %arg13[%c0_41, %c0_42] : memref<4x256xf32, #tpu.memory_space<vmem>>, vector<4x256xf32>
      %69 = vector.shape_cast %68 : vector<4x256xf32> to vector<1x4x256xf32>
      %cst_43 = arith.constant dense<0.000000e+00> : vector<1xf32>
      %70 = vector.multi_reduction <add>, %69, %cst_43 [1, 2] : vector<1x4x256xf32> to vector<1xf32>
      %71 = vector.shape_cast %70 : vector<1xf32> to vector<1x1x1xf32>
      %72 = vector.extract %71[0, 0, 0] : f32 from vector<1x1x1xf32>
      %c0_44 = arith.constant 0 : index
      %c0_45 = arith.constant 0 : index
      %73 = vector.load %arg14[%c0_44, %c0_45] : memref<16x256xf32, #tpu.memory_space<vmem>>, vector<16x256xf32>
      %c0_46 = arith.constant 0 : index
      %c0_47 = arith.constant 0 : index
      %74 = vector.load %arg10[%c0_46, %c0_47] : memref<16x1xf32, #tpu.memory_space<vmem>>, vector<16x1xf32>
      %75 = vector.broadcast %74 : vector<16x1xf32> to vector<16x256xf32>
      %76 = arith.mulf %73, %75 : vector<16x256xf32>
      %77 = vector.shape_cast %76 : vector<16x256xf32> to vector<1x16x256xf32>
      %cst_48 = arith.constant dense<0.000000e+00> : vector<1xf32>
      %78 = vector.multi_reduction <add>, %77, %cst_48 [1, 2] : vector<1x16x256xf32> to vector<1xf32>
      %79 = vector.shape_cast %78 : vector<1xf32> to vector<1x1x1xf32>
      %80 = vector.extract %79[0, 0, 0] : f32 from vector<1x1x1xf32>
      %81 = vector.broadcast %72 : f32 to vector<8x128xf32>
      %c0_49 = arith.constant 0 : index
      %c0_50 = arith.constant 0 : index
      %c0_51 = arith.constant 0 : index
      %82 = vector.load %arg11[%c0_49, %c0_50, %c0_51] : memref<1x8x128xf32, #tpu.memory_space<vmem>>, vector<1x8x128xf32>
      %83 = vector.shape_cast %82 : vector<1x8x128xf32> to vector<8x128xf32>
      %84 = vector.shape_cast %81 : vector<8x128xf32> to vector<1x8x128xf32>
      tpu.vector_store %arg11[%c0_49, %c0_50, %c0_51], %84 {strides = array<i32>} : memref<1x8x128xf32, #tpu.memory_space<vmem>>, vector<1x8x128xf32>,
      %85 = vector.broadcast %80 : f32 to vector<8x128xf32>
      %c0_52 = arith.constant 0 : index
      %c0_53 = arith.constant 0 : index
      %c0_54 = arith.constant 0 : index
      %86 = vector.load %arg12[%c0_52, %c0_53, %c0_54] : memref<1x8x128xf32, #tpu.memory_space<vmem>>, vector<1x8x128xf32>
      %87 = vector.shape_cast %86 : vector<1x8x128xf32> to vector<8x128xf32>
      %88 = vector.shape_cast %85 : vector<8x128xf32> to vector<1x8x128xf32>
      tpu.vector_store %arg12[%c0_52, %c0_53, %c0_54], %88 {strides = array<i32>} : memref<1x8x128xf32, #tpu.memory_space<vmem>>, vector<1x8x128xf32>,
    } else {
    }
    return
  }
  func.func @transform_0(%arg0: i32, %arg1: i32) -> (i32, i32, i32) {
    %c0_i32 = arith.constant 0 : i32
    %c0_i32_0 = arith.constant 0 : i32
    return %arg0, %c0_i32, %arg1 : i32, i32, i32
  }
  func.func @transform_1(%arg0: i32, %arg1: i32) -> (i32, i32, i32) {
    %c0_i32 = arith.constant 0 : i32
    %c0_i32_0 = arith.constant 0 : i32
    return %arg0, %c0_i32, %arg1 : i32, i32, i32
  }
  func.func @transform_2(%arg0: i32, %arg1: i32) -> (i32, i32) {
    %c0_i32 = arith.constant 0 : i32
    %c0_i32_0 = arith.constant 0 : i32
    %c0_i32_1 = arith.constant 0 : i32
    return %c0_i32, %c0_i32_0 : i32, i32
  }
  func.func @transform_3(%arg0: i32, %arg1: i32) -> (i32, i32) {
    %c0_i32 = arith.constant 0 : i32
    %c0_i32_0 = arith.constant 0 : i32
    %c0_i32_1 = arith.constant 0 : i32
    return %c0_i32, %c0_i32_0 : i32, i32
  }
  func.func @transform_4(%arg0: i32, %arg1: i32) -> (i32, i32) {
    %c0_i32 = arith.constant 0 : i32
    %c0_i32_0 = arith.constant 0 : i32
    %c0_i32_1 = arith.constant 0 : i32
    return %c0_i32, %c0_i32_0 : i32, i32
  }
  func.func @transform_5(%arg0: i32, %arg1: i32) -> (i32, i32) {
    %c0_i32 = arith.constant 0 : i32
    %c0_i32_0 = arith.constant 0 : i32
    %c0_i32_1 = arith.constant 0 : i32
    return %c0_i32, %c0_i32_0 : i32, i32
  }
  func.func @transform_6(%arg0: i32, %arg1: i32) -> (i32, i32) {
    %c0_i32 = arith.constant 0 : i32
    %c0_i32_0 = arith.constant 0 : i32
    %c0_i32_1 = arith.constant 0 : i32
    return %c0_i32, %c0_i32_0 : i32, i32
  }
  func.func @transform_7(%arg0: i32, %arg1: i32) -> (i32, i32) {
    %c0_i32 = arith.constant 0 : i32
    %c0_i32_0 = arith.constant 0 : i32
    %c0_i32_1 = arith.constant 0 : i32
    return %c0_i32, %c0_i32_0 : i32, i32
  }
  func.func @transform_8(%arg0: i32, %arg1: i32) -> (i32, i32) {
    %c0_i32 = arith.constant 0 : i32
    %c0_i32_0 = arith.constant 0 : i32
    %c0_i32_1 = arith.constant 0 : i32
    return %c0_i32, %c0_i32_0 : i32, i32
  }
  func.func @transform_9(%arg0: i32, %arg1: i32) -> (i32, i32, i32) {
    %c0_i32 = arith.constant 0 : i32
    %c0_i32_0 = arith.constant 0 : i32
    %c0_i32_1 = arith.constant 0 : i32
    return %arg0, %c0_i32, %c0_i32_0 : i32, i32, i32
  }
  func.func @transform_10(%arg0: i32, %arg1: i32) -> (i32, i32, i32) {
    %c0_i32 = arith.constant 0 : i32
    %c0_i32_0 = arith.constant 0 : i32
    %c0_i32_1 = arith.constant 0 : i32
    return %arg0, %c0_i32, %c0_i32_0 : i32, i32, i32
  }
}

</mosaic_0001>

<bundles_post_ra>
// kernel: tpu_custom_call.1
= control target key start
LH: loop header
LB: loop body
LE: loop exit
PB: predicated region body
PF: predicated region fallthrough
CT: control target
= control target key end

     0   :  { %s1908_s0 = inlined_call_operand.vmem [shape: f32[2,4,256], index: 0, kind: input, shape index: {}]   ;;  %s1909_s1 = inlined_call_operand.vmem [shape: f32[2,4,256], index: 1, kind: input, shape index: {}]   ;;  %s1910_s2 = inlined_call_operand.vmem [shape: f32[32,4], index: 2, kind: input, shape index: {}]   ;;  %s1911_s3 = inlined_call_operand.vmem [shape: f32[32,1], index: 3, kind: input, shape index: {}]   ;;  %s1912_s4 = inlined_call_operand.vmem [shape: f32[3,32], index: 4, kind: input, shape index: {}]   ;;  %s1913_s5 = inlined_call_operand.vmem [shape: f32[3,1], index: 5, kind: input, shape index: {}]   ;;  %s1914_s6 = inlined_call_operand.vmem [shape: f32[16,3], index: 6, kind: input, shape index: {}]   ;;  %s1915_s7 = inlined_call_operand.vmem [shape: f32[16,1], index: 7, kind: input, shape index: {}]   ;;  %s1916_s8 = inlined_call_operand.vmem [shape: f32[16,1], index: 8, kind: input, shape index: {}]   ;;  %s1917_s9 = inlined_call_operand.hbm [shape: f32[2,8,128], index: 9, kind: output, shape index: {0}]   ;;  %s1918_s10 = inlined_call_operand.hbm [shape: f32[2,8,128], index: 10, kind: output, shape index: {1}]  }
   0x1   :  { %1923 = sst [smem:[#allocation13_spill]] %s1908_s0 }
   0x2   :  { %16 = vsyncpa [#allocation5], 0 }
   0x3   :  { %18 = vsyncpa [#allocation5 + $0x1], 0 }
   0x4   :  { %19 = vsyncpa [#allocation7], 0 }
   0x5   :  { %21 = vsyncpa [#allocation7 + $0x1], 0  ;;  %s1650_s13 = smov 0   ;;  %s1652_s14 = smov 0  }
   0x6   :  { %s1654_s15 = smov 0   ;;  %s1656_s16 = smov 0  }
   0x7   :  { %s1658_s17 = smov 0   ;;  %s1660_s18 = smov 0  }
   0x8 LB: > { %1924 = sst [smem:[#allocation10_spill]] %s1585_s17  ;;  %s1356_s19 = sadd.s32 4294967295, %s1589_s18   ;;  %s1589_s18 = sphi %s1660_s18, %s27_s18   ;;  %s1585_s17 = sphi %s1658_s17, %s1934_s17   ;;  %s1581_s16 = sphi %s1656_s16, %s1933_s16   ;;  %s1577_s15 = sphi %s1654_s15, %s1937_s15   ;;  %s1573_s14 = sphi %s1652_s14, %s1936_s14   ;;  %s1569_s13 = sphi %s1650_s13, %s1935_s13  }
   0x9   : > { %s1357_s20 = sadd.s32 4294967294, %s1589_s18   ;;  %s39_s21 = sadd.s32 1, %s1585_s17 }
   0xa   : > { %s249_s22 = sadd.s32 1, %s1577_s15  ;;  %p41_p0 = scmp.ge.s32.totalorder %s39_s21, 2 }
   0xb   : > { %p259_p1 = scmp.ne.s32.totalorder %s1577_s15, %s1573_s14  ;;  %p260_p2 = scmp.eq.s32.totalorder %s1356_s19, 1 }
   0xc   : > { %p265_p3 = scmp.ne.s32.totalorder %s1573_s14, %s1569_s13  ;;  %s1939_s21 = smov (%p41_p0, %s39_s21), 0 }
   0xd   : > { %1925 = sst [smem:[#allocation11_spill]] %s1939_s21  ;;  %p1690_p4 = por %p260_p2, %p259_p1 }
   0xe   : > { %p266_p5 = scmp.eq.s32.totalorder %s1357_s20, 1  ;;  %s246_s24 = ssub.s32 %s1585_s17, %s1939_s21 }
   0xf   : > { %p1360_p6 = scmp.ge.s32.totalorder %s1589_s18, 1  ;;  %p247_p7 = scmp.eq.s32.totalorder %s246_s24, 0 }
  0x10   : > { %p1697_p8 = por %p266_p5, %p265_p3  ;;  %p357_p9 = scmp.lt.s32.totalorder %s1589_s18, 3 }
  0x11   : > { %s1703_s26 = scalar_select %p247_p7, %s1577_s15, %s249_s22  }
  0x12   : > { %p358_p10 = pnand %p1360_p6, %p357_p9 }
  0x13   : > { %1928 = sst [smem:[#allocation12_spill]] %s1703_s26  ;;  %p414_p11 = scmp.lt.s32.totalorder (!%p358_p10), %s1581_s16, 1 }
  0x14   : > { %361 = sbr.rel (%p358_p10) target bundleno = 1141 (0x475), region = 56  ;;  %s1929_s0 = sld [smem:[#allocation13_spill]] (!%p358_p10) }
  0x15   : > { %s1836_s28 = sand.u32 (!%p358_p10), 1, %s1573_s14   ;;  %s1593_s24 = smov (!%p358_p10), [#allocation4]  }
  0x16   : > { %s1202_s20 = scalar_lea.sflag (!%p358_p10), [#allocation5], %s1836_s28  ;;  %s1487_s27 = sshll.u32 (!%p358_p10), %s1593_s24, 4  ;;  %s1488_s27 = int_to_ptr.vmem [resolvable:$false] %s1487_s27 }
  0x19   : > { %v1591_v0 = vmov 0.0   ;;  %v456_v1 = vld [vmem:[%s1911_s3 + $0x18] sm:$0xff]  ;;  %s415_s29 = scalar_select %p414_p11, %s1581_s16, 1  ;;  %v1592_v2 = vmov 0   ;;  %v454_v3 = vld [vmem:[%s1911_s3 + $0x8] sm:$0xff]  ;;  %v455_v4 = vld [vmem:[%s1911_s3 + $0x10] sm:$0xff] }
  0x1a   : > { %567 = vmatprep.mubr.f32.mxu0 %v1591_v0  ;;  %673 = vmatprep.mubr.f32.mxu1 %v1591_v0  ;;  %v453_v5 = vld [vmem:[%s1911_s3] sm:$0xff]  ;;  %vm498_vm0 = vcmask 1043456   ;;  %vm485_vm1 = vcmask 31744   ;;  %v450_v13 = vld [vmem:[%s1910_s2 + $0x8] sm:$0xff]  ;;  %v451_v16 = vld [vmem:[%s1910_s2 + $0x10] sm:$0xff]  ;;  %vm605_vm2 = vcmask 261120  }
  0x1b   : > { %1464 = vset.pattern.permute.xlu1 %v1592_v2  ;;  %1463 = vset.pattern.permute.xlu0 %v1592_v2  ;;  %s1395_s12 = sshll.u32 %s415_s29, 3  ;;  %v449_v10 = vld [vmem:[%s1910_s2] sm:$0xff]  ;;  %v462_v14 = vld [vmem:[%s1915_s7 + $0x8] sm:$0xff]  ;;  %v452_v18 = vld [vmem:[%s1910_s2 + $0x18] sm:$0xff]  ;;  %vm697_vm3 = vcmask 1042432   ;;  %vm690_vm4 = vcmask 23552  }
  0x1c   : > { %480 = vperm.xlu0 %1463, %v456_v1   ;;  %470 = vperm.xlu1 %1464, %v454_v3   ;;  %s421_s21 = scalar_lea.vmem %s1929_s0, %s1395_s12  ;;  %s431_s30 = scalar_lea.vmem %s1909_s1, %s1395_s12  ;;  %v458_v11 = vld [vmem:[%s1913_s5] sm:$0x7]  ;;  %v1170_v17 = vld [vmem:[%s1916_s8 + $0x8] sm:$0xff] }
  0x1d   : > { %v1727_v6 = vld [vmem:[%s421_s21] sm:$0xff]  ;;  %s1921_s21 = sshll.u32 %s1581_s16, 7 }
  0x1e   : > { %v1729_v7 = vld [vmem:[%s431_s30] sm:$0xff]  ;;  %v484_v8 = vcombine.high %v1727_v6, %v1727_v6  ;;  %s1922_s30 = sshll.u32 %s1836_s28, 3  ;;  %s1218_s19 = scalar_lea.hbm %s1917_s9, %s1921_s21 }
  0x1f   : > { %v826_v9 = vcombine.high %v1729_v7, %v1729_v7  ;;  %v461_v12 = vld [vmem:[%s1915_s7] sm:$0xff]  ;;  %s405_s11 = scalar_lea.vmem [#allocation4], %s1922_s30 }
  0x20   : > { %475 = vperm.xlu0 %1463, %v455_v4   ;;  %465 = vperm.xlu1 %1464, %v453_v5   ;;  %v1169_v15 = vld [vmem:[%s1916_s8] sm:$0xff]  ;;  %s1220_s17 = sshll.u32 %s405_s11, 4  ;;  %s1221_s17 = int_to_ptr.vmem [resolvable:$true] %s1220_s17 }
  0x21   : > { %1367 = vmatprep.subr.msk.mxu0 %vm498_vm0, %v484_v8  ;;  %v457_v47 = vld [vmem:[%s1912_s4] sm:$0x7]  ;;  %s1483_s22 = scalar_lea.vmem %s1221_s17, 128  ;;  %p1490_p1 = scmp.lt.s32.totalorder %s1221_s17, %s1488_s27 }
  0x22   : > { %1368 = vmatpush1.msk.msra.mxu0 %vm498_vm0, %v1727_v6  ;;  %v459_v2 = vld [vmem:[%s1914_s6] sm:$0xff]  ;;  %p1484_p12 = scmp.ne.s32.totalorder %s1221_s17, %s1483_s22 }
  0x23   : > { %1369 = vmatmul.mubr.msk.f32.vlgmr.msra.gmra.mxu0 %vm485_vm1, %v449_v10  ;;  %1378 = vmatprep.subr.msk.mxu0 %vm498_vm0, %v826_v9 }
  0x24   : > { %573 = vmatprep.mubr.f32.mxu0 %v1591_v0  ;;  %1379 = vmatpush1.msk.msra.mxu0 %vm498_vm0, %v1729_v7  ;;  %p1485_p13 = pnand %p1484_p12, %p1690_p4 }
  0x25   : > { %602 = vperm.xlu0 %1463, %v458_v11   ;;  %682 = vperm.xlu1 %1464, %v461_v12  }
  0x26   : > { %p1486_p0 = pneg %p1485_p13 }
  0x27   : > { %1370 = vmatmul.mubr.msk.f32.gmra.mxu0 %vm485_vm1, %v450_v13 }
  0x28   : > { %579 = vmatprep.mubr.f32.mxu0 %v1591_v0 }
  0x29   : > { %687 = vperm.xlu0 %1463, %v462_v14   ;;  %1173 = vperm.xlu1 %1464, %v1169_v15  }
  0x2b   : > { %1371 = vmatmul.mubr.msk.f32.gmra.mxu0 %vm485_vm1, %v451_v16 }
  0x2c   : > { %585 = vmatprep.mubr.f32.mxu0 %v1591_v0 }
  0x2d   : > { %1178 = vperm.xlu0 %1463, %v1170_v17  }
  0x2f   : > { %1372 = vmatmul.mubr.msk.f32.gmra.mxu0 %vm485_vm1, %v452_v18 }
  0x30   : > { %895 = vmatprep.mubr.f32.mxu0 %v1591_v0 }
  0x33   : > { %1380 = vmatmul.mubr.msk.f32.vlgmr.msra.gmra.mxu0 %vm485_vm1, %v449_v10 }
  0x34   : > { %901 = vmatprep.mubr.f32.mxu0 %v1591_v0 }
  0x37   : > { %1381 = vmatmul.mubr.msk.f32.gmra.mxu0 %vm485_vm1, %v450_v13  ;;  %v460_v13 = vld [vmem:[%s1914_s6 + $0x8] sm:$0xff] }
  0x38   : > { %907 = vmatprep.mubr.f32.mxu0 %v1591_v0 }
  0x3b   : > { %1382 = vmatmul.mubr.msk.f32.gmra.mxu0 %vm485_vm1, %v451_v16 }
  0x3c   : > { %913 = vmatprep.mubr.f32.mxu0 %v1591_v0 }
  0x3f   : > { %1383 = vmatmul.mubr.msk.f32.gmra.mxu0 %vm485_vm1, %v452_v18 }
  0x97   : > { %v481_v23 = vpop.permute.xlu0 %480  ;;  %v471_v26 = vpop.permute.xlu1 %470 }
  0x9b   : > { %v476_v28 = vpop.permute.xlu0 %475  ;;  %v466_v34 = vpop.permute.xlu1 %465 }
  0xa0   : > { %v603_v58 = vpop.permute.xlu0 %602  ;;  %v1802_v18 = vpop.permute.xlu1 %682 }
  0xe3   : > { %v569_v19 = vpop.f32.mrf.mxu0 }
  0xe4   : > { %v570_v41 = vadd.f32 %v569_v19, %v466_v34 }
  0xe5   : > { %v571_v20 = vpop.f32.mrf.mxu0 }
  0xe6   : > { %v572_v39 = vadd.f32 %v571_v20, %v466_v34  ;;  %v592_v46 = vmax.f32 %v570_v41, 0.0 }
  0xe7   : > { %v575_v21 = vpop.f32.mrf.mxu0 }
  0xe8   : > { %v576_v37 = vadd.f32 %v575_v21, %v471_v26  ;;  %v593_v45 = vmax.f32 %v572_v39, 0.0 }
  0xe9   : > { %v577_v22 = vpop.f32.mrf.mxu0 }
  0xea   : > { %v578_v35 = vadd.f32 %v577_v22, %v471_v26  ;;  %v594_v44 = vmax.f32 %v576_v37, 0.0 }
  0xeb   : > { %v581_v24 = vpop.f32.mrf.mxu0 }
  0xec   : > { %v582_v33 = vadd.f32 %v581_v24, %v476_v28  ;;  %v595_v43 = vmax.f32 %v578_v35, 0.0 }
  0xed   : > { %v583_v25 = vpop.f32.mrf.mxu0 }
  0xee   : > { %v584_v31 = vadd.f32 %v583_v25, %v476_v28  ;;  %v596_v42 = vmax.f32 %v582_v33, 0.0 }
  0xef   : > { %v587_v27 = vpop.f32.mrf.mxu0 }
  0xf0   : > { %v588_v29 = vadd.f32 %v587_v27, %v481_v23  ;;  %v597_v40 = vmax.f32 %v584_v31, 0.0 }
  0xf1   : > { %v589_v30 = vpop.f32.mrf.mxu0 }
  0xf2   : > { %v590_v32 = vadd.f32 %v589_v30, %v481_v23  ;;  %v598_v38 = vmax.f32 %v588_v29, 0.0 }
  0xf3   : > { %v897_v48 = vpop.f32.mrf.mxu0 }
  0xf4   : > { %v599_v36 = vmax.f32 %v590_v32, 0.0  ;;  %v898_v11 = vadd.f32 %v897_v48, %v466_v34 }
  0xf5   : > { %v899_v49 = vpop.f32.mrf.mxu0 }
  0xf6   : > { %633 = vmatprep.subr.mxu1 %v599_v36  ;;  %v900_v9 = vadd.f32 %v899_v49, %v466_v34  ;;  %v920_v17 = vmax.f32 %v898_v11, 0.0 }
  0xf7   : > { %634 = vmatpush1.msra.mxu1 %v598_v38  ;;  %v903_v50 = vpop.f32.mrf.mxu0 }
  0xf8   : > { %635 = vmatprep.subr.mxu1 %v597_v40  ;;  %v904_v5 = vadd.f32 %v903_v50, %v471_v26  ;;  %v921_v16 = vmax.f32 %v900_v9, 0.0 }
  0xf9   : > { %636 = vmatpush1.msra.mxu1 %v596_v42  ;;  %v905_v51 = vpop.f32.mrf.mxu0 }
  0xfa   : > { %637 = vmatprep.subr.mxu1 %v595_v43  ;;  %v906_v3 = vadd.f32 %v905_v51, %v471_v26  ;;  %v922_v15 = vmax.f32 %v904_v5, 0.0 }
  0xfb   : > { %638 = vmatpush1.msra.mxu1 %v594_v44  ;;  %v909_v52 = vpop.f32.mrf.mxu0 }
  0xfc   : > { %639 = vmatprep.subr.mxu1 %v593_v45  ;;  %v910_v63 = vadd.f32 %v909_v52, %v476_v28  ;;  %v923_v14 = vmax.f32 %v906_v3, 0.0 }
  0xfd   : > { %640 = vmatpush1.msra.mxu1 %v592_v46  ;;  %v911_v53 = vpop.f32.mrf.mxu0 }
  0xfe   : > { %1373 = vmatmul.mubr.msk.f32.vlgmr.msra.gmra.mxu1 %vm605_vm2, %v457_v47  ;;  %v912_v61 = vadd.f32 %v911_v53, %v476_v28  ;;  %v924_v12 = vmax.f32 %v910_v63, 0.0 }
  0xff   : > { %768 = vmatprep.mubr.f32.mxu1 %v1591_v0  ;;  %v915_v54 = vpop.f32.mrf.mxu0 }
 0x100   : > { %v916_v59 = vadd.f32 %v915_v54, %v481_v23  ;;  %v925_v10 = vmax.f32 %v912_v61, 0.0 }
 0x101   : > { %v917_v55 = vpop.f32.mrf.mxu0 }
 0x102   : > { %v918_v57 = vadd.f32 %v917_v55, %v481_v23  ;;  %v926_v8 = vmax.f32 %v916_v59, 0.0  ;;  %v1806_v23 = vpop.permute.xlu0 %687 }
 0x104   : > { %v927_v4 = vmax.f32 %v918_v57, 0.0 }
 0x1be   : > { %v675_v56 = vpop.f32.mrf.mxu1 }
 0x1bf   : > { %v676_v1 = vadd.f32 %v675_v56, %v603_v58 }
 0x1c0   : > { %v677_v60 = vpop.f32.mrf.mxu1 }
 0x1c1   : > { %v678_v62 = vadd.f32 %v677_v60, %v603_v58 }
 0x1c3   : > { %1374 = vmatprep.subr.msk.mxu1 %vm697_vm3, %v678_v62 }
 0x1c4   : > { %1375 = vmatpush1.msk.msra.mxu1 %vm697_vm3, %v676_v1 }
 0x1c5   : > { %1376 = vmatmul.mubr.msk.f32.vlgmr.msra.gmra.mxu1 %vm690_vm4, %v459_v2  ;;  %952 = vmatprep.subr.mxu1 %v927_v4 }
 0x1c6   : > { %953 = vmatpush1.msra.mxu1 %v926_v8  ;;  %774 = vmatprep.mubr.f32.mxu1 %v1591_v0 }
 0x1c7   : > { %954 = vmatprep.subr.mxu1 %v925_v10  ;;  %v444_v10 = vsub.f32 %v1727_v6, %v1729_v7 }
 0x1c8   : > { %955 = vmatpush1.msra.mxu1 %v924_v12 }
 0x1c9   : > { %1377 = vmatmul.mubr.msk.f32.gmra.mxu1 %vm690_vm4, %v460_v13  ;;  %956 = vmatprep.subr.mxu1 %v923_v14  ;;  %v446_v11 = vmul.f32 %v444_v10, %v444_v10 }
 0x1ca   : > { %957 = vmatpush1.msra.mxu1 %v922_v15  ;;  %992 = vmatprep.mubr.f32.mxu1 %v1591_v0 }
 0x1cb   : > { %958 = vmatprep.subr.mxu1 %v921_v16  ;;  %v1151_v12 = vcombine.high %v446_v11, %v446_v11 }
 0x1cc   : > { %959 = vmatpush1.msra.mxu1 %v920_v17 }
 0x1cd   : > { %1384 = vmatmul.mubr.msk.f32.vlgmr.msra.gmra.mxu1 %vm605_vm2, %v457_v47  ;;  %v1154_v14 = vsel %vm498_vm0, %v1151_v12, 0.0 }
 0x1ce   : > { %1069 = vmatprep.mubr.f32.mxu1 %v1591_v0 }
 0x285   : > { %v770_v19 = vpop.f32.mrf.mxu1 }
 0x286   : > { %v771_v20 = vadd.f32 %v770_v19, %v1802_v18 }
 0x287   : > { %v772_v21 = vpop.f32.mrf.mxu1 }
 0x288   : > { %v773_v22 = vadd.f32 %v772_v21, %v1802_v18  ;;  %v781_v25 = vmax.f32 %v771_v20, 0.0 }
 0x289   : > { %v776_v24 = vpop.f32.mrf.mxu1 }
 0x28a   : > { %v777_v26 = vadd.f32 %v776_v24, %v1806_v23  ;;  %v782_v28 = vmax.f32 %v773_v22, 0.0  ;;  %v785_v32 = vmul.f32 %v781_v25, %v781_v25 }
 0x28b   : > { %v778_v27 = vpop.f32.mrf.mxu1 }
 0x28c   : > { %v783_v29 = vmax.f32 %v777_v26, 0.0  ;;  %v779_v30 = vadd.f32 %v778_v27, %v1806_v23  ;;  %v786_v36 = vmul.f32 %v782_v28, %v782_v28 }
 0x28d   : > { %v994_v31 = vpop.f32.mrf.mxu1 }
 0x28e   : > { %v787_v33 = vmul.f32 %v783_v29, %v783_v29  ;;  %v784_v34 = vmax.f32 %v779_v30, 0.0  ;;  %v995_v40 = vadd.f32 %v994_v31, %v603_v58 }
 0x28f   : > { %v996_v35 = vpop.f32.mrf.mxu1 }
 0x290   : > { %v789_v37 = vadd.f32 %v787_v33, %v785_v32  ;;  %v788_v38 = vmul.f32 %v784_v34, %v784_v34  ;;  %v997_v39 = vadd.f32 %v996_v35, %v603_v58 }
 0x292   : > { %v790_v41 = vrot.slane %v789_v37, 4  ;;  %v796_v42 = vadd.f32 %v788_v38, %v786_v36  ;;  %1385 = vmatprep.subr.msk.mxu1 %vm697_vm3, %v997_v39 }
 0x293   : > { %1386 = vmatpush1.msk.msra.mxu1 %vm697_vm3, %v995_v40 }
 0x294   : > { %v791_v43 = vadd.f32 %v790_v41, %v789_v37  ;;  %v797_v44 = vrot.slane %v796_v42, 4  ;;  %1387 = vmatmul.mubr.msk.f32.vlgmr.msra.gmra.mxu1 %vm690_vm4, %v459_v2 }
 0x295   : > { %1075 = vmatprep.mubr.f32.mxu1 %v1591_v0 }
 0x296   : > { %v792_v45 = vrot.slane %v791_v43, 2  ;;  %v798_v46 = vadd.f32 %v797_v44, %v796_v42 }
 0x298   : > { %v793_v47 = vadd.f32 %v792_v45, %v791_v43  ;;  %v799_v48 = vrot.slane %v798_v46, 2  ;;  %1388 = vmatmul.mubr.msk.f32.gmra.mxu1 %vm690_vm4, %v460_v13  ;;  %v1153_v13 = vsel %vm498_vm0, %v446_v11, 0.0  ;;  %v1174_v11 = vpop.permute.xlu1 %1173 }
 0x299   : > { %v1155_v15 = vadd.f32 %v1154_v14, %v1153_v13 }
 0x29a   : > { %v794_v49 = vrot.slane %v793_v47, 1  ;;  %v800_v50 = vadd.f32 %v799_v48, %v798_v46 }
 0x29b   : > { %1156 = vadd.xlane.f32.xlu1 %v1155_v15  ;;  %v1179_v15 = vpop.permute.xlu0 %1178 }
 0x29c   : > { %v795_v51 = vadd.f32 %v794_v49, %v793_v47  ;;  %v801_v52 = vrot.slane %v800_v50, 1 }
 0x29e   : > { %1467 = vrsqrt.f32 %v795_v51  ;;  %v802_v53 = vadd.f32 %v801_v52, %v800_v50  ;;  %vm805_vm5 = vcmp.eq.f32.partialorder %v795_v51, inf  ;;  %v808_v56 = vand.u32 2147483648, %v795_v51 }
 0x29f   : > { %vm807_vm6 = vcmp.eq.f32.partialorder %v795_v51, 0.0 }
 0x2a0   : > { %1469 = vrsqrt.f32 %v802_v53  ;;  %vm812_vm7 = vcmp.eq.f32.partialorder %v802_v53, inf  ;;  %v815_v61 = vand.u32 2147483648, %v802_v53  ;;  %vm814_vm8 = vcmp.eq.f32.partialorder %v802_v53, 0.0 }
 0x2ab   : > { %v1468_v54 = vpop.eup %1467 }
 0x2ac   : > { %v804_v55 = vmul.f32 %v1468_v54, %v795_v51 }
 0x2ad   : > { %v1470_v57 = vpop.eup %1469 }
 0x2ae   : > { %v806_v58 = vsel %vm805_vm5, %v795_v51, %v804_v55  ;;  %v811_v59 = vmul.f32 %v1470_v57, %v802_v53 }
 0x2af   : > { %v809_v0 = vsel %vm807_vm6, %v808_v56, %v806_v58 }
 0x2b0   : > { %v817_v60 = vadd.f32 1e-10, %v809_v0  ;;  %v813_v62 = vsel %vm812_vm7, %v802_v53, %v811_v59 }
 0x2b1   : > { %v816_v63 = vsel %vm814_vm8, %v815_v61, %v813_v62 }
 0x2b2   : > { %1471 = vrcp.f32 %v817_v60  ;;  %v818_v1 = vadd.f32 1e-10, %v816_v63 }
 0x2b4   : > { %1473 = vrcp.f32 %v818_v1 }
 0x2bf   : > { %v1472_v2 = vpop.eup %1471 }
 0x2c0   : > { %v1815_v3 = vmul.f32 %v1472_v2, %v783_v29  ;;  %v1817_v4 = vmul.f32 %v1472_v2, %v781_v25 }
 0x2c1   : > { %v1474_v5 = vpop.eup %1473 }
 0x2c2   : > { %v1819_v8 = vmul.f32 %v1474_v5, %v784_v34  ;;  %v1821_v9 = vmul.f32 %v1474_v5, %v782_v28 }
 0x354   : > { %v1071_v16 = vpop.f32.mrf.mxu1 }
 0x355   : > { %v1072_v17 = vadd.f32 %v1071_v16, %v1802_v18 }
 0x356   : > { %v1073_v19 = vpop.f32.mrf.mxu1 }
 0x357   : > { %v1074_v20 = vadd.f32 %v1073_v19, %v1802_v18  ;;  %v1082_v22 = vmax.f32 %v1072_v17, 0.0 }
 0x358   : > { %v1077_v21 = vpop.f32.mrf.mxu1 }
 0x359   : > { %v1078_v24 = vadd.f32 %v1077_v21, %v1806_v23  ;;  %v1083_v6 = vmax.f32 %v1074_v20, 0.0  ;;  %v1086_v27 = vmul.f32 %v1082_v22, %v1082_v22  ;;  %v1157_v20 = vpop.xlane.xlu1 %1156 }
 0x35a   : > { %v1079_v25 = vpop.f32.mrf.mxu1 }
 0x35b   : > { %v1084_v7 = vmax.f32 %v1078_v24, 0.0  ;;  %v1080_v26 = vadd.f32 %v1079_v25, %v1806_v23  ;;  %v1087_v30 = vmul.f32 %v1083_v6, %v1083_v6 }
 0x35d   : > { %v1088_v28 = vmul.f32 %v1084_v7, %v1084_v7  ;;  %v1085_v29 = vmax.f32 %v1080_v26, 0.0 }
 0x35f   : > { %v1090_v31 = vadd.f32 %v1088_v28, %v1086_v27  ;;  %v1089_v32 = vmul.f32 %v1085_v29, %v1085_v29 }
 0x361   : > { %v1091_v33 = vrot.slane %v1090_v31, 4  ;;  %v1097_v34 = vadd.f32 %v1089_v32, %v1087_v30 }
 0x363   : > { %v1092_v35 = vadd.f32 %v1091_v33, %v1090_v31  ;;  %v1098_v36 = vrot.slane %v1097_v34, 4 }
 0x365   : > { %v1093_v18 = vrot.slane %v1092_v35, 2  ;;  %v1099_v37 = vadd.f32 %v1098_v36, %v1097_v34 }
 0x367   : > { %v1094_v38 = vadd.f32 %v1093_v18, %v1092_v35  ;;  %v1100_v39 = vrot.slane %v1099_v37, 2 }
 0x369   : > { %v1095_v40 = vrot.slane %v1094_v38, 1  ;;  %v1101_v41 = vadd.f32 %v1100_v39, %v1099_v37 }
 0x36b   : > { %v1096_v42 = vadd.f32 %v1095_v40, %v1094_v38  ;;  %v1102_v43 = vrot.slane %v1101_v41, 1 }
 0x36d   : > { %1475 = vrsqrt.f32 %v1096_v42  ;;  %v1103_v23 = vadd.f32 %v1102_v43, %v1101_v41  ;;  %vm1106_vm9 = vcmp.eq.f32.partialorder %v1096_v42, inf  ;;  %v1109_v46 = vand.u32 2147483648, %v1096_v42 }
 0x36e   : > { %vm1108_vm10 = vcmp.eq.f32.partialorder %v1096_v42, 0.0 }
 0x36f   : > { %1477 = vrsqrt.f32 %v1103_v23  ;;  %vm1113_vm11 = vcmp.eq.f32.partialorder %v1103_v23, inf  ;;  %v1116_v52 = vand.u32 2147483648, %v1103_v23  ;;  %vm1115_vm12 = vcmp.eq.f32.partialorder %v1103_v23, 0.0 }
 0x37a   : > { %v1476_v44 = vpop.eup %1475 }
 0x37b   : > { %v1105_v45 = vmul.f32 %v1476_v44, %v1096_v42 }
 0x37c   : > { %v1478_v47 = vpop.eup %1477 }
 0x37d   : > { %v1107_v48 = vsel %vm1106_vm9, %v1096_v42, %v1105_v45  ;;  %v1112_v50 = vmul.f32 %v1478_v47, %v1103_v23 }
 0x37e   : > { %v1110_v49 = vsel %vm1108_vm10, %v1109_v46, %v1107_v48 }
 0x37f   : > { %v1118_v51 = vadd.f32 1e-10, %v1110_v49  ;;  %v1114_v53 = vsel %vm1113_vm11, %v1103_v23, %v1112_v50 }
 0x380   : > { %v1117_v54 = vsel %vm1115_vm12, %v1116_v52, %v1114_v53 }
 0x381   : > { %1479 = vrcp.f32 %v1118_v51  ;;  %v1119_v55 = vadd.f32 1e-10, %v1117_v54 }
 0x383   : > { %1481 = vrcp.f32 %v1119_v55 }
 0x38e   : > { %v1480_v56 = vpop.eup %1479 }
 0x38f   : > { %v1124_v57 = vmul.f32 %v1480_v56, %v1084_v7  ;;  %v1121_v58 = vmul.f32 %v1480_v56, %v1082_v22 }
 0x390   : > { %v1482_v0 = vpop.eup %1481 }
 0x391   : > { %v1126_v59 = vsub.f32 %v1817_v4, %v1121_v58  ;;  %v1128_v60 = vsub.f32 %v1815_v3, %v1124_v57  ;;  %v1125_v61 = vmul.f32 %v1482_v0, %v1085_v29  ;;  %v1123_v62 = vmul.f32 %v1482_v0, %v1083_v6 }
 0x393   : > { %v1129_v63 = vsub.f32 %v1819_v8, %v1125_v61  ;;  %v1127_v1 = vsub.f32 %v1821_v9, %v1123_v62  ;;  %v1134_v2 = vmul.f32 %v1126_v59, %v1126_v59  ;;  %v1136_v5 = vmul.f32 %v1128_v60, %v1128_v60 }
 0x394   : > { %v1158_v8 = vrot.slane %v1157_v20, 4 }
 0x395   : > { %v1135_v10 = vmul.f32 %v1127_v1, %v1127_v1  ;;  %v1137_v12 = vmul.f32 %v1129_v63, %v1129_v63  ;;  %v1181_v13 = vmul.f32 %v1174_v11, %v1134_v2  ;;  %v1183_v16 = vmul.f32 %v1179_v15, %v1136_v5 }
 0x396   : > { %v1159_v9 = vadd.f32 %v1158_v8, %v1157_v20 }
 0x397   : > { %v1182_v14 = vmul.f32 %v1174_v11, %v1135_v10  ;;  %v1184_v4 = vmul.f32 %v1179_v15, %v1137_v12 }
 0x398   : > { %v1160_v21 = vrot.slane %v1159_v9, 2 }
 0x399   : > { %v1185_v17 = vadd.f32 %v1182_v14, %v1181_v13 }
 0x39a   : > { %v1161_v22 = vadd.f32 %v1160_v21, %v1159_v9 }
 0x39b   : > { %v1186_v19 = vadd.f32 %v1185_v17, %v1183_v16 }
 0x39c   : > { %v1162_v24 = vrot.slane %v1161_v22, 1 }
 0x39d   : > { %v1187_v3 = vadd.f32 %v1186_v19, %v1184_v4 }
 0x39e   : > { %v1163_v25 = vadd.f32 %v1162_v24, %v1161_v22 }
 0x39f   : > { %1188 = vadd.xlane.f32.xlu0 %v1187_v3 }
 0x3a0   : > { %1397 = vpush %v1163_v25 }
 0x3d1   : > { %s1398_s29 = spop %1397 }
 0x3d2   : > { %v1197_v6 = vstv %s1398_s29  ;;  %s1489_s29 = scalar_lea.vmem %s1488_s27, 256 }
 0x3d3   : > { %1198 = vst [vmem:[%s405_s11] sm:$0xff] %v1197_v6  ;;  %p1491_p2 = scmp.lt.s32.totalorder %s1489_s29, %s1483_s22 }
 0x3d5   : > { %p1492_p3 = por %p1491_p2, %p1490_p1 }
 0x3d7   : > { %p1493_p5 = pnand %p1492_p3, %p1486_p0 }
 0x3d9   : > { %1496 = shalt.err (!%p1493_p5)
}
 0x3da   : > { %s1497_s11 = scalar_lea.hbm %s1218_s19, 128  ;;  %s1501_s21 = scalar_lea.hbm %s1917_s9, 256 }
 0x3db   : > { %p1498_p6 = scmp.ne.s32.totalorder %s1218_s19, %s1497_s11  ;;  %p1502_p10 = scmp.lt.s32.totalorder %s1218_s19, %s1917_s9 }
 0x3dc   : > { %p1503_p11 = scmp.lt.s32.totalorder %s1501_s21, %s1497_s11 }
 0x3dd   : > { %p1499_p7 = pnand %p1498_p6, %p1690_p4 }
 0x3de   : > { %p1504_p12 = por %p1503_p11, %p1502_p10 }
 0x3df   : > { %p1500_p9 = pneg %p1499_p7 }
 0x3e1   : > { %p1505_p13 = pnand %p1504_p12, %p1500_p9 }
 0x3e3   : > { %1508 = shalt.err (!%p1505_p13)
}
 0x3e4   : > { %1401 = dma.vmem_to_hbm [thread:$0]  (%p1690_p4), %s1221_s17, 128, %s1218_s19, %s1202_s20  }
 0x3e5   : > { %s1930_s0 = sshll.u32 %s1836_s28, 3  ;;  %s1931_s17 = sshll.u32 %s1581_s16, 7 }
 0x3e6   : > { %s412_s30 = scalar_lea.vmem [#allocation6], %s1930_s0  ;;  %s1231_s24 = scalar_lea.hbm %s1918_s10, %s1931_s17 }
 0x3e7   : > { %s1233_s21 = sshll.u32 %s412_s30, 4  ;;  %s1207_s27 = scalar_lea.sflag [#allocation7], %s1836_s28  ;;  %s1862_s21 = int_to_ptr.vmem [resolvable:$true] %s1233_s21 }
 0x3e8   : > { %s1509_s29 = scalar_lea.vmem %s1862_s21, 128  ;;  %s1594_s11 = smov [#allocation6]  }
 0x3e9   : > { %p1510_p0 = scmp.ne.s32.totalorder %s1862_s21, %s1509_s29  ;;  %s1513_s26 = sshll.u32 %s1594_s11, 4  ;;  %s1514_s26 = int_to_ptr.vmem [resolvable:$false] %s1513_s26 }
 0x3ea   : > { %s1515_s12 = scalar_lea.vmem %s1514_s26, 256  ;;  %p1516_p3 = scmp.lt.s32.totalorder %s1862_s21, %s1514_s26 }
 0x3eb   : > { %p1511_p1 = pnand %p1510_p0, %p1690_p4  ;;  %p1517_p5 = scmp.lt.s32.totalorder %s1515_s12, %s1509_s29 }
 0x3ed   : > { %p1512_p2 = pneg %p1511_p1  ;;  %p1518_p6 = por %p1517_p5, %p1516_p3 }
 0x3ef   : > { %p1519_p7 = pnand %p1518_p6, %p1512_p2 }
 0x428   : > { %v1189_v7 = vpop.xlane.xlu0 %1188 }
 0x429   : > { %v1190_v26 = vrot.slane %v1189_v7, 4 }
 0x42b   : > { %v1191_v27 = vadd.f32 %v1190_v26, %v1189_v7 }
 0x42d   : > { %v1192_v28 = vrot.slane %v1191_v27, 2 }
 0x42f   : > { %v1193_v29 = vadd.f32 %v1192_v28, %v1191_v27 }
 0x431   : > { %v1194_v30 = vrot.slane %v1193_v29, 1 }
 0x433   : > { %v1195_v31 = vadd.f32 %v1194_v30, %v1193_v29 }
 0x435   : > { %1399 = vpush %v1195_v31 }
 0x466   : > { %s1400_s22 = spop %1399 }
 0x467   : > { %v1199_v32 = vstv %s1400_s22 }
 0x468   : > { %1200 = vst [vmem:[%s412_s30] sm:$0xff] %v1199_v32 }
 0x469   : > { %1522 = shalt.err (!%p1519_p7)
}
 0x46a   : > { %s1523_s16 = scalar_lea.hbm %s1231_s24, 128  ;;  %s1527_s30 = scalar_lea.hbm %s1918_s10, 256 }
 0x46b   : > { %p1524_p9 = scmp.ne.s32.totalorder %s1231_s24, %s1523_s16  ;;  %p1528_p12 = scmp.lt.s32.totalorder %s1231_s24, %s1918_s10 }
 0x46c   : > { %p1529_p13 = scmp.lt.s32.totalorder %s1527_s30, %s1523_s16 }
 0x46d   : > { %p1525_p10 = pnand %p1524_p9, %p1690_p4 }
 0x46e   : > { %p1530_p0 = por %p1529_p13, %p1528_p12 }
 0x46f   : > { %p1526_p11 = pneg %p1525_p10 }
 0x471   : > { %p1531_p1 = pnand %p1530_p0, %p1526_p11 }
 0x473   : > { %1534 = shalt.err (!%p1531_p1)
}
 0x474   : > { %1402 = dma.vmem_to_hbm [thread:$0]  (%p1690_p4), %s1862_s21, 128, %s1231_s24, %s1207_s27  }
 0x475 PF: > { %p1412_p2 = scmp.ge.s32.totalorder %s1589_s18, 2  ;;  %s1245_s19 = sand.u32 1, %s1569_s13  }
 0x476   : > { %s1246_s20 = scalar_lea.sflag [#allocation5], %s1245_s19 }
 0x477   : > { %p1406_p3 = pnand %p1412_p2, %p1697_p8 }
 0x479   : > { %p1407_p5 = pneg %p1406_p3 }
 0x47b   : > { %1560 = dma.done.wait (%p1407_p5), %s1246_s20, 128  }
 0x47c   : > { %1562 = vsyncadd (%p1407_p5), %s1246_s20, 4294967168  ;;  %s1255_s29 = scalar_lea.sflag [#allocation7], %s1245_s19 }
 0x47d   : > { %1564 = dma.done.wait (%p1407_p5), %s1255_s29, 128  }
 0x47e   : > { %1566 = vsyncadd (%p1407_p5), %s1255_s29, 4294967168  ;;  %s27_s18 = sadd.s32 1, %s1589_s18   ;;  %s1932_s23 = sld [smem:[#allocation12_spill]] }
 0x47f   : > { %p24_p6 = scmp.ge.s32.totalorder %s27_s18, 4   ;;  %s1933_s16 = sld [smem:[#allocation10_spill]] }
 0x480   : > { %s1934_s17 = sld [smem:[#allocation11_spill]]  ;;  %s1935_s13 = smov %s1573_s14 }
 0x481   : > { %s1936_s14 = smov %s1577_s15  ;;  %26 = sbr.rel (!%p24_p6) target bundleno = 8 (0x8), region = 119 }
 0x484   : > { %s1937_s15 = smov %s1932_s23 }
 0x486   :  { %1260 = vsyncpa [#allocation5], 1 }
 0x487   :  { %1262 = vsyncpa [#allocation5 + $0x1], 1 }
 0x488   :  { %1263 = vsyncpa [#allocation7], 1 }
 0x489   :  { %1265 = vsyncpa [#allocation7 + $0x1], 1 }

</bundles_post_ra>
